<compile_context>
chip_gen: v5e
topology: v5e:2x2
jax: 0.10.0
libtpu: 0.0.40
codegen_flags: <defaults>
</compile_context>

<pallas_src>
import functools

import jax
import jax.numpy as jnp
import numpy as np
from jax.experimental import pallas as pl
from jax.experimental.pallas import tpu as pltpu


_TIME_CHUNK = 8          # sublane tile: recursion / stores processed 8 rows at a time


def _round_up(x, m):
    return ((x + m - 1) // m) * m


def _tpu_vmem_bytes_and_cores():
    """Physical per-core VMEM bytes and an estimate of TensorCores per chip."""
    try:
        info = pltpu.get_tpu_info()
        phys = int(getattr(info, "vmem_capacity_bytes", 128 * 1024 * 1024))
    except Exception:
        phys = 64 * 1024 * 1024          # conservative default if query fails
    # v7x: 64 MiB per TC and 2 TCs; v5e/v6e/v5p: 128 MiB, 1 TC worth sharding.
    n_tc = 2 if phys <= 96 * 1024 * 1024 else 1
    return phys, n_tc


def _pick_tile_b(B, T, D, itemsize):
    """Batch tile: lane-dense multiple of 128, sized against *padded* VMEM use."""
    phys, n_tc = _tpu_vmem_bytes_and_cores()
    if B <= 128:
        return B, phys                                  # one full-array block
    # Padded bytes of one batch row of an obs/next_obs block in VMEM.
    sub = max(8, 32 // itemsize)                        # sublane granularity
    row_bytes = _round_up(T, sub) * _round_up(D, 128) * itemsize
    budget = int(0.45 * phys)        # obs + next_obs, each double-buffered (4 blocks)
    cap = 1024 if phys >= 100 * 1024 * 1024 else 512    # bigger tiles on 128-MiB parts
    fit = max(1, budget // (4 * row_bytes))
    tile = 128
    while tile * 2 <= min(fit, cap) and B >= tile * 2:
        tile *= 2
    # v7x (2 TensorCores): the "parallel" batch axis needs >= 2 grid steps.
    if n_tc >= 2:
        while tile > 128 and -(-B // tile) < 2:
            tile //= 2
    return tile, phys


def _td_lambda_kernel(time_chunk,
                      obs_ref, nobs_ref, rew_ref, done_ref, w_ref,
                      bias_ref, gl_ref,
                      adv_ref, val_ref,
                      base_ref, coef_ref):
    """One batch tile, chunked over time in 8-row slabs.

    obs_ref, nobs_ref : (tile_b, T, D)  input dtype   native-layout observations
    rew_ref, done_ref : (T, tile_b)     f32           time-major, batch on lanes
    w_ref             : (1, 1, D)       f32           value-head weight
    bias_ref          : (1,)            f32  SMEM     value-head bias
    gl_ref            : (2,)            f32  SMEM     [gamma, lmbda]
    adv_ref, val_ref  : (T, tile_b)     f32           outputs
    base_ref, coef_ref: (T, tile_b)     f32  VMEM     staged recursion coefficients
    """
    f32 = jnp.float32
    T = adv_ref.shape[0]
    bias = bias_ref[0]
    gamma = gl_ref[0]
    lmbda = gl_ref[1]
    one_m_lmbda = 1.0 - lmbda
    w = w_ref[...].astype(f32)                                  # (1, 1, D)

    n_chunks = -(-T // time_chunk)                              # static python int

    # ---- Phase 1: value head + coefficient staging (forward over time) ----
    # Per chunk: one dense (tc, tile_b) store each to val/base/coef; v and nv
    # are never simultaneously live, keeping vreg pressure flat.
    g = None
    for c in range(n_chunks):
        t0 = c * time_chunk
        tc = min(time_chunk, T - t0)

        o = obs_ref[:, t0:t0 + tc, :].astype(f32)               # (tile_b, tc, D)
        v_t = (jnp.sum(o * w, axis=-1) + bias).T                # (tc, tile_b)
        val_ref[t0:t0 + tc, :] = v_t

        no = nobs_ref[:, t0:t0 + tc, :].astype(f32)
        nv_t = (jnp.sum(no * w, axis=-1) + bias).T              # (tc, tile_b)

        gnd = gamma * (1.0 - done_ref[t0:t0 + tc, :])           # gamma*(1-done)
        coef_ref[t0:t0 + tc, :] = lmbda * gnd
        base_ref[t0:t0 + tc, :] = (rew_ref[t0:t0 + tc, :]
                                   + gnd * (one_m_lmbda * nv_t))
        if c == n_chunks - 1:
            g = nv_t[tc - 1:tc, :]                              # bootstrap value

    # ---- Phase 2: backward recursion, 8-row slabs in registers -------------
    # Per step: g = base[t] + coef[t] * g  (single FMA chain, lanes = batch).
    for c in range(n_chunks - 1, -1, -1):
        t0 = c * time_chunk
        tc = min(time_chunk, T - t0)
        base = base_ref[t0:t0 + tc, :]                          # (tc, tile_b)
        coef = coef_ref[t0:t0 + tc, :]
        rows = [None] * tc
        for r in range(tc - 1, -1, -1):                         # static, unrolled
            g = base[r:r + 1, :] + coef[r:r + 1, :] * g
            rows[r] = g
        rets = rows[0] if tc == 1 else jnp.concatenate(rows, axis=0)
        adv_ref[t0:t0 + tc, :] = rets - val_ref[t0:t0 + tc, :]  # dense slab store


def td_lambda_estimate(obs, next_obs, reward, done, w, b, *, gamma, lmbda):
    """Wrapper mimicking TDLambdaEstimate.forward.

    obs, next_obs : [B, T, D] float32 or bfloat16
    reward, done  : [B, T, 1] float / bool
    w             : [D] float32   value-head weight
    b             : []  float32   value-head bias
    Returns dict with 'advantage' and 'state_value', both [B, T, 1] float32.
    """
    B, T, D = obs.shape
    f32 = jnp.float32

    # Big tensors keep their native dtype and [B, T, D] layout: no HBM copies.
    # Tiny per-step arrays go time-major (T, B) so the recursion is lane-dense.
    rew_tb = jnp.transpose(reward[..., 0].astype(f32), (1, 0))      # (T, B)
    done_tb = jnp.transpose(done[..., 0].astype(f32), (1, 0))       # (T, B)
    w3 = w.astype(f32).reshape(1, 1, D)                             # (1, 1, D)
    b1 = jnp.asarray(b, f32).reshape(1)                             # (1,)  SMEM
    gl = jnp.stack([jnp.asarray(gamma, f32), jnp.asarray(lmbda, f32)])  # (2,) SMEM
    # TODO(synk): average_rewards=True would standardize `reward` here.

    itemsize = jnp.dtype(obs.dtype).itemsize
    tile_b, phys_vmem = _pick_tile_b(B, T, D, itemsize)
    n_tiles = -(-B // tile_b)            # ceil-div grid; last block is masked

    kernel = functools.partial(_td_lambda_kernel, _TIME_CHUNK)

    grid_spec = pltpu.PrefetchScalarGridSpec(
        num_scalar_prefetch=0,
        grid=(n_tiles,),
        in_specs=[
            pl.BlockSpec((tile_b, T, D), lambda i: (i, 0, 0)),       # obs
            pl.BlockSpec((tile_b, T, D), lambda i: (i, 0, 0)),       # next_obs
            pl.BlockSpec((T, tile_b), lambda i: (0, i)),             # reward
            pl.BlockSpec((T, tile_b), lambda i: (0, i)),             # done
            pl.BlockSpec((1, 1, D), lambda i: (0, 0, 0)),            # weight
            pl.BlockSpec(memory_space=pltpu.MemorySpace.SMEM),       # bias
            pl.BlockSpec(memory_space=pltpu.MemorySpace.SMEM),       # gamma/lmbda
        ],
        out_specs=(
            pl.BlockSpec((T, tile_b), lambda i: (0, i)),             # advantage
            pl.BlockSpec((T, tile_b), lambda i: (0, i)),             # state value
        ),
        scratch_shapes=[pltpu.VMEM((T, tile_b), f32),                # base
                        pltpu.VMEM((T, tile_b), f32)],               # coef
    )

    # Padding-aware scoped-VMEM request, capped at 75% of physical VMEM so it
    # fits v7x (48 MiB of 64) and can use up to ~96 MiB on v5e/v6e.
    sub = max(8, 32 // itemsize)
    obs_block = tile_b * _round_up(T, sub) * _round_up(D, 128) * itemsize
    small_block = _round_up(T, 8) * _round_up(tile_b, 128) * 4
    w_block = 8 * _round_up(D, 128) * 4
    need = 4 * obs_block + 10 * small_block + 2 * w_block
    vmem_limit = int(min(0.75 * phys_vmem,
                         max(24 * 1024 * 1024, 1.3 * need)))

    adv_tb, val_tb = pl.pallas_call(
        kernel,
        out_shape=(jax.ShapeDtypeStruct((T, B), f32),
                   jax.ShapeDtypeStruct((T, B), f32)),
        grid_spec=grid_spec,
        compiler_params=pltpu.CompilerParams(
            dimension_semantics=("parallel",),        # batch tiles -> megacore
            vmem_limit_bytes=vmem_limit,
        ),
    )(obs, next_obs, rew_tb, done_tb, w3, b1, gl)

    # Back to torchrl convention [B, T, 1] (tiny relayouts only).
    advantage = jnp.transpose(adv_tb, (1, 0))[..., None]
    state_value = jnp.transpose(val_tb, (1, 0))[..., None]
    return {"advantage": advantage, "state_value": state_value}


def _reference(obs, next_obs, reward, done, w, b, *, gamma, lmbda):
    """Pure-JAX reference matching torchrl.td_lambda_advantage_estimate."""
    value = (jnp.sum(obs * w, axis=-1) + b)[..., None]           # [B, T, 1]
    next_value = (jnp.sum(next_obs * w, axis=-1) + b)[..., None]
    not_done = 1.0 - done.astype(jnp.float32)
    T = value.shape[1]
    g = next_value[:, -1, :]
    rets = [None] * T
    for t in range(T - 1, -1, -1):
        g = reward[:, t, :] + gamma * not_done[:, t, :] * (
            (1.0 - lmbda) * next_value[:, t, :] + lmbda * g)
        rets[t] = g
    returns = jnp.stack(rets, axis=1)
    return returns - value, value


if __name__ == "__main__":
    B, T, D = 4, 8, 32
    gamma, lmbda = 0.99, 0.95

    key = jax.random.PRNGKey(0)
    k_obs, k_nobs, k_rew, k_done, k_w = jax.random.split(key, 5)

    obs = jax.random.normal(k_obs, (B, T, D), dtype=jnp.float32)
    next_obs = jax.random.normal(k_nobs, (B, T, D), dtype=jnp.float32)
    reward = jax.random.normal(k_rew, (B, T, 1), dtype=jnp.float32)
    done = (jax.random.uniform(k_done, (B, T, 1)) < 0.1).astype(jnp.float32)

    # deterministic value-network parameters (Linear(D -> 1))
    w = jax.random.normal(k_w, (D,), dtype=jnp.float32) / jnp.sqrt(D)
    b = jnp.float32(0.1)

    out = td_lambda_estimate(obs, next_obs, reward, done, w, b,
                             gamma=gamma, lmbda=lmbda)
    jax.block_until_ready(out)

    ref_adv, ref_val = _reference(obs, next_obs, reward, done, w, b,
                                  gamma=gamma, lmbda=lmbda)
    np.testing.assert_allclose(np.asarray(out["advantage"]), np.asarray(ref_adv),
                               rtol=1e-5, atol=1e-5)
    np.testing.assert_allclose(np.asarray(out["state_value"]), np.asarray(ref_val),
                               rtol=1e-5, atol=1e-5)
    print("KERNEL_OK")
</pallas_src>

<mosaic_0001>
module attributes {stable_mosaic.version = 11 : i64} {
  func.func @_td_lambda_kernel(%arg0: i32, %arg1: memref<4x8x32xf32, #tpu.memory_space<vmem>>, %arg2: memref<4x8x32xf32, #tpu.memory_space<vmem>>, %arg3: memref<8x4xf32, #tpu.memory_space<vmem>>, %arg4: memref<8x4xf32, #tpu.memory_space<vmem>>, %arg5: memref<1x1x32xf32, #tpu.memory_space<vmem>>, %arg6: memref<1xf32, #tpu.memory_space<smem>>, %arg7: memref<2xf32, #tpu.memory_space<smem>>, %arg8: memref<8x4xf32, #tpu.memory_space<vmem>>, %arg9: memref<8x4xf32, #tpu.memory_space<vmem>>, %arg10: memref<8x4xf32, #tpu.memory_space<vmem>>, %arg11: memref<8x4xf32, #tpu.memory_space<vmem>>) attributes {dimension_semantics = [#tpu.dimension_semantics<parallel>], iteration_bounds = array<i64: 1>, scalar_prefetch = 0 : i64, scratch_operands = 2 : i64, tpu.core_type = #tpu.core_type<tc>, window_params = [{transform_indices = @transform_0, window_bounds = array<i64: 4, 8, 32>}, {transform_indices = @transform_1, window_bounds = array<i64: 4, 8, 32>}, {transform_indices = @transform_2, window_bounds = array<i64: 8, 4>}, {transform_indices = @transform_3, window_bounds = array<i64: 8, 4>}, {pipeline_mode = #tpu.pipeline_mode<synchronous>, transform_indices = @transform_4, window_bounds = array<i64: 1, 1, 32>}, {transform_indices = @transform_5, window_bounds = array<i64: 1>}, {transform_indices = @transform_6, window_bounds = array<i64: 2>}, {transform_indices = @transform_7, window_bounds = array<i64: 8, 4>}, {transform_indices = @transform_8, window_bounds = array<i64: 8, 4>}]} {
    %c0 = arith.constant 0 : index
    %0 = memref.load %arg6[%c0] : memref<1xf32, #tpu.memory_space<smem>>
    %c0_0 = arith.constant 0 : index
    %1 = memref.load %arg7[%c0_0] : memref<2xf32, #tpu.memory_space<smem>>
    %c1 = arith.constant 1 : index
    %2 = memref.load %arg7[%c1] : memref<2xf32, #tpu.memory_space<smem>>
    %cst = arith.constant 1.000000e+00 : f32
    %3 = arith.subf %cst, %2 : f32
    %c0_1 = arith.constant 0 : index
    %c0_2 = arith.constant 0 : index
    %c0_3 = arith.constant 0 : index
    %4 = vector.load %arg5[%c0_1, %c0_2, %c0_3] : memref<1x1x32xf32, #tpu.memory_space<vmem>>, vector<1x1x32xf32>
    %c0_4 = arith.constant 0 : index
    %c0_5 = arith.constant 0 : index
    %c0_6 = arith.constant 0 : index
    %5 = vector.load %arg1[%c0_4, %c0_5, %c0_6] : memref<4x8x32xf32, #tpu.memory_space<vmem>>, vector<4x8x32xf32>
    %6 = vector.broadcast %4 : vector<1x1x32xf32> to vector<4x8x32xf32>
    %7 = arith.mulf %5, %6 : vector<4x8x32xf32>
    %cst_7 = arith.constant dense<0.000000e+00> : vector<4x8xf32>
    %8 = vector.multi_reduction <add>, %7, %cst_7 [2] : vector<4x8x32xf32> to vector<4x8xf32>
    %9 = vector.broadcast %0 : f32 to vector<4x8xf32>
    %10 = arith.addf %8, %9 : vector<4x8xf32>
    %11 = tpu.transpose %10, [1, 0] : vector<4x8xf32> -> vector<8x4xf32>
    %c0_8 = arith.constant 0 : index
    %c0_9 = arith.constant 0 : index
    %12 = vector.load %arg9[%c0_8, %c0_9] : memref<8x4xf32, #tpu.memory_space<vmem>>, vector<8x4xf32>
    tpu.vector_store %arg9[%c0_8, %c0_9], %11 {strides = array<i32>} : memref<8x4xf32, #tpu.memory_space<vmem>>, vector<8x4xf32>,
    %c0_10 = arith.constant 0 : index
    %c0_11 = arith.constant 0 : index
    %c0_12 = arith.constant 0 : index
    %13 = vector.load %arg2[%c0_10, %c0_11, %c0_12] : memref<4x8x32xf32, #tpu.memory_space<vmem>>, vector<4x8x32xf32>
    %14 = vector.broadcast %4 : vector<1x1x32xf32> to vector<4x8x32xf32>
    %15 = arith.mulf %13, %14 : vector<4x8x32xf32>
    %cst_13 = arith.constant dense<0.000000e+00> : vector<4x8xf32>
    %16 = vector.multi_reduction <add>, %15, %cst_13 [2] : vector<4x8x32xf32> to vector<4x8xf32>
    %17 = vector.broadcast %0 : f32 to vector<4x8xf32>
    %18 = arith.addf %16, %17 : vector<4x8xf32>
    %19 = tpu.transpose %18, [1, 0] : vector<4x8xf32> -> vector<8x4xf32>
    %c0_14 = arith.constant 0 : index
    %c0_15 = arith.constant 0 : index
    %20 = vector.load %arg4[%c0_14, %c0_15] : memref<8x4xf32, #tpu.memory_space<vmem>>, vector<8x4xf32>
    %cst_16 = arith.constant 1.000000e+00 : f32
    %21 = vector.broadcast %cst_16 : f32 to vector<8x4xf32>
    %22 = arith.subf %21, %20 : vector<8x4xf32>
    %23 = vector.broadcast %1 : f32 to vector<8x4xf32>
    %24 = arith.mulf %23, %22 : vector<8x4xf32>
    %25 = vector.broadcast %2 : f32 to vector<8x4xf32>
    %26 = arith.mulf %25, %24 : vector<8x4xf32>
    %c0_17 = arith.constant 0 : index
    %c0_18 = arith.constant 0 : index
    %27 = vector.load %arg11[%c0_17, %c0_18] : memref<8x4xf32, #tpu.memory_space<vmem>>, vector<8x4xf32>
    tpu.vector_store %arg11[%c0_17, %c0_18], %26 {strides = array<i32>} : memref<8x4xf32, #tpu.memory_space<vmem>>, vector<8x4xf32>,
    %c0_19 = arith.constant 0 : index
    %c0_20 = arith.constant 0 : index
    %28 = vector.load %arg3[%c0_19, %c0_20] : memref<8x4xf32, #tpu.memory_space<vmem>>, vector<8x4xf32>
    %29 = vector.broadcast %3 : f32 to vector<8x4xf32>
    %30 = arith.mulf %29, %19 : vector<8x4xf32>
    %31 = arith.mulf %24, %30 : vector<8x4xf32>
    %32 = arith.addf %28, %31 : vector<8x4xf32>
    %c0_21 = arith.constant 0 : index
    %c0_22 = arith.constant 0 : index
    %33 = vector.load %arg10[%c0_21, %c0_22] : memref<8x4xf32, #tpu.memory_space<vmem>>, vector<8x4xf32>
    tpu.vector_store %arg10[%c0_21, %c0_22], %32 {strides = array<i32>} : memref<8x4xf32, #tpu.memory_space<vmem>>, vector<8x4xf32>,
    %34 = vector.extract_strided_slice %19 {offsets = [7, 0], sizes = [1, 4], strides = [1, 1]} : vector<8x4xf32> to vector<1x4xf32>
    %c0_23 = arith.constant 0 : index
    %c0_24 = arith.constant 0 : index
    %35 = vector.load %arg10[%c0_23, %c0_24] : memref<8x4xf32, #tpu.memory_space<vmem>>, vector<8x4xf32>
    %c0_25 = arith.constant 0 : index
    %c0_26 = arith.constant 0 : index
    %36 = vector.load %arg11[%c0_25, %c0_26] : memref<8x4xf32, #tpu.memory_space<vmem>>, vector<8x4xf32>
    %37 = vector.extract_strided_slice %35 {offsets = [7, 0], sizes = [1, 4], strides = [1, 1]} : vector<8x4xf32> to vector<1x4xf32>
    %38 = vector.extract_strided_slice %36 {offsets = [7, 0], sizes = [1, 4], strides = [1, 1]} : vector<8x4xf32> to vector<1x4xf32>
    %39 = arith.mulf %38, %34 : vector<1x4xf32>
    %40 = arith.addf %37, %39 : vector<1x4xf32>
    %41 = vector.extract_strided_slice %35 {offsets = [6, 0], sizes = [1, 4], strides = [1, 1]} : vector<8x4xf32> to vector<1x4xf32>
    %42 = vector.extract_strided_slice %36 {offsets = [6, 0], sizes = [1, 4], strides = [1, 1]} : vector<8x4xf32> to vector<1x4xf32>
    %43 = arith.mulf %42, %40 : vector<1x4xf32>
    %44 = arith.addf %41, %43 : vector<1x4xf32>
    %45 = vector.extract_strided_slice %35 {offsets = [5, 0], sizes = [1, 4], strides = [1, 1]} : vector<8x4xf32> to vector<1x4xf32>
    %46 = vector.extract_strided_slice %36 {offsets = [5, 0], sizes = [1, 4], strides = [1, 1]} : vector<8x4xf32> to vector<1x4xf32>
    %47 = arith.mulf %46, %44 : vector<1x4xf32>
    %48 = arith.addf %45, %47 : vector<1x4xf32>
    %49 = vector.extract_strided_slice %35 {offsets = [4, 0], sizes = [1, 4], strides = [1, 1]} : vector<8x4xf32> to vector<1x4xf32>
    %50 = vector.extract_strided_slice %36 {offsets = [4, 0], sizes = [1, 4], strides = [1, 1]} : vector<8x4xf32> to vector<1x4xf32>
    %51 = arith.mulf %50, %48 : vector<1x4xf32>
    %52 = arith.addf %49, %51 : vector<1x4xf32>
    %53 = vector.extract_strided_slice %35 {offsets = [3, 0], sizes = [1, 4], strides = [1, 1]} : vector<8x4xf32> to vector<1x4xf32>
    %54 = vector.extract_strided_slice %36 {offsets = [3, 0], sizes = [1, 4], strides = [1, 1]} : vector<8x4xf32> to vector<1x4xf32>
    %55 = arith.mulf %54, %52 : vector<1x4xf32>
    %56 = arith.addf %53, %55 : vector<1x4xf32>
    %57 = vector.extract_strided_slice %35 {offsets = [2, 0], sizes = [1, 4], strides = [1, 1]} : vector<8x4xf32> to vector<1x4xf32>
    %58 = vector.extract_strided_slice %36 {offsets = [2, 0], sizes = [1, 4], strides = [1, 1]} : vector<8x4xf32> to vector<1x4xf32>
    %59 = arith.mulf %58, %56 : vector<1x4xf32>
    %60 = arith.addf %57, %59 : vector<1x4xf32>
    %61 = vector.extract_strided_slice %35 {offsets = [1, 0], sizes = [1, 4], strides = [1, 1]} : vector<8x4xf32> to vector<1x4xf32>
    %62 = vector.extract_strided_slice %36 {offsets = [1, 0], sizes = [1, 4], strides = [1, 1]} : vector<8x4xf32> to vector<1x4xf32>
    %63 = arith.mulf %62, %60 : vector<1x4xf32>
    %64 = arith.addf %61, %63 : vector<1x4xf32>
    %65 = vector.extract_strided_slice %35 {offsets = [0, 0], sizes = [1, 4], strides = [1, 1]} : vector<8x4xf32> to vector<1x4xf32>
    %66 = vector.extract_strided_slice %36 {offsets = [0, 0], sizes = [1, 4], strides = [1, 1]} : vector<8x4xf32> to vector<1x4xf32>
    %67 = arith.mulf %66, %64 : vector<1x4xf32>
    %68 = arith.addf %65, %67 : vector<1x4xf32>
    %69 = tpu.concatenate %68, %64, %60, %56, %52, %48, %44, %40 in 0 : vector<1x4xf32>, vector<1x4xf32>, vector<1x4xf32>, vector<1x4xf32>, vector<1x4xf32>, vector<1x4xf32>, vector<1x4xf32>, vector<1x4xf32> -> vector<8x4xf32>
    %c0_27 = arith.constant 0 : index
    %c0_28 = arith.constant 0 : index
    %70 = vector.load %arg9[%c0_27, %c0_28] : memref<8x4xf32, #tpu.memory_space<vmem>>, vector<8x4xf32>
    %71 = arith.subf %69, %70 : vector<8x4xf32>
    %c0_29 = arith.constant 0 : index
    %c0_30 = arith.constant 0 : index
    %72 = vector.load %arg8[%c0_29, %c0_30] : memref<8x4xf32, #tpu.memory_space<vmem>>, vector<8x4xf32>
    tpu.vector_store %arg8[%c0_29, %c0_30], %71 {strides = array<i32>} : memref<8x4xf32, #tpu.memory_space<vmem>>, vector<8x4xf32>,
    return
  }
  func.func @transform_0(%arg0: i32) -> (i32, i32, i32) {
    %c0_i32 = arith.constant 0 : i32
    %c0_i32_0 = arith.constant 0 : i32
    %c0_i32_1 = arith.constant 0 : i32
    return %arg0, %c0_i32, %c0_i32_0 : i32, i32, i32
  }
  func.func @transform_1(%arg0: i32) -> (i32, i32, i32) {
    %c0_i32 = arith.constant 0 : i32
    %c0_i32_0 = arith.constant 0 : i32
    %c0_i32_1 = arith.constant 0 : i32
    return %arg0, %c0_i32, %c0_i32_0 : i32, i32, i32
  }
  func.func @transform_2(%arg0: i32) -> (i32, i32) {
    %c0_i32 = arith.constant 0 : i32
    %c0_i32_0 = arith.constant 0 : i32
    return %c0_i32, %arg0 : i32, i32
  }
  func.func @transform_3(%arg0: i32) -> (i32, i32) {
    %c0_i32 = arith.constant 0 : i32
    %c0_i32_0 = arith.constant 0 : i32
    return %c0_i32, %arg0 : i32, i32
  }
  func.func @transform_4(%arg0: i32) -> (i32, i32, i32) {
    %c0_i32 = arith.constant 0 : i32
    %c0_i32_0 = arith.constant 0 : i32
    %c0_i32_1 = arith.constant 0 : i32
    %c0_i32_2 = arith.constant 0 : i32
    return %c0_i32, %c0_i32_0, %c0_i32_1 : i32, i32, i32
  }
  func.func @transform_5(%arg0: i32) -> i32 {
    %c0_i32 = arith.constant 0 : i32
    %c0_i32_0 = arith.constant 0 : i32
    return %c0_i32 : i32
  }
  func.func @transform_6(%arg0: i32) -> i32 {
    %c0_i32 = arith.constant 0 : i32
    %c0_i32_0 = arith.constant 0 : i32
    return %c0_i32 : i32
  }
  func.func @transform_7(%arg0: i32) -> (i32, i32) {
    %c0_i32 = arith.constant 0 : i32
    %c0_i32_0 = arith.constant 0 : i32
    return %c0_i32, %arg0 : i32, i32
  }
  func.func @transform_8(%arg0: i32) -> (i32, i32) {
    %c0_i32 = arith.constant 0 : i32
    %c0_i32_0 = arith.constant 0 : i32
    return %c0_i32, %arg0 : i32, i32
  }
}

</mosaic_0001>

<bundles_post_ra>
// kernel: tpu_custom_call.1
= control target key start
LH: loop header
LB: loop body
LE: loop exit
PB: predicated region body
PF: predicated region fallthrough
CT: control target
= control target key end

     0   :  { %15 = vsyncpa [#allocation6], 0  ;;  %s489_s0 = inlined_call_operand.hbm [shape: f32[4,8,32], index: 0, kind: input, shape index: {}]   ;;  %s490_s1 = inlined_call_operand.hbm [shape: f32[4,8,32], index: 1, kind: input, shape index: {}]   ;;  %s491_s2 = inlined_call_operand.vmem [shape: f32[8,4], index: 2, kind: input, shape index: {}]   ;;  %s492_s3 = inlined_call_operand.vmem [shape: f32[8,4], index: 3, kind: input, shape index: {}]   ;;  %s493_s4 = inlined_call_operand.vmem [shape: f32[1,1,32], index: 4, kind: input, shape index: {}]   ;;  %s494_s5 = inlined_call_operand.<no memory space> [shape: f32[1], index: 5, kind: input, shape index: {}]   ;;  %s495_s6 = inlined_call_operand.vmem [shape: f32[2], index: 6, kind: input, shape index: {}]   ;;  %s496_s7 = inlined_call_operand.vmem [shape: f32[8,4], index: 7, kind: output, shape index: {0}]   ;;  %s497_s8 = inlined_call_operand.vmem [shape: f32[8,4], index: 8, kind: output, shape index: {1}]  }
   0x1   :  { %16 = vsyncpa [#allocation9], 0  ;;  %s22_s29 = sshll.u32 %s489_s0, 4  ;;  %s23_s29 = int_to_ptr.hbm [resolvable:$true] %s22_s29 }
   0x2   :  { %17 = vsyncpa [#allocation7], 0  ;;  %s381_s30 = smov [#allocation5]   ;;  %s35_s12 = sshll.u32 %s490_s1, 4  ;;  %s36_s12 = int_to_ptr.hbm [resolvable:$true] %s35_s12 }
   0x3   :  { %s24_s9 = sshll.u32 %s381_s30, 4  ;;  %s382_s13 = smov 128   ;;  %s25_s9 = int_to_ptr.vmem [resolvable:$true] %s24_s9 }
   0x4   :  { %s383_s14 = smov 8   ;;  %s384_s15 = smov [#allocation8]  }
   0x5   :  { %30 = dma.hbm_to_vmem [thread:$0]  %s23_s29, 512, %s25_s9, [#allocation6], %s382_s13, %s382_s13, %s383_s14  }
   0x6   :  { %s37_s16 = sshll.u32 %s384_s15, 4  ;;  %s57_s19 = sshll.u32 %s495_s6, 4  ;;  %s38_s16 = int_to_ptr.vmem [resolvable:$true] %s37_s16  ;;  %s58_s19 = int_to_ptr.vmem [resolvable:$true] %s57_s19 }
   0x7   :  { %43 = dma.hbm_to_vmem [thread:$0]  %s36_s12, 512, %s38_s16, [#allocation9], %s382_s13, %s382_s13, %s383_s14  }
   0x8   :  { %s385_s0 = smov [#allocation10]  }
   0x9   :  { %60 = dma.vmem_to_smem %s58_s19, 16, %s385_s0, [#allocation7]  }
   0xa   :  { %375 = dma.done.wait [#allocation6], 512  }
   0xb   :  { %376 = vsyncadd [#allocation6], 4294966784 }
   0xc   :  { %377 = dma.done.wait [#allocation9], 512  }
   0xd   :  { %378 = vsyncadd [#allocation9], 4294966784 }
   0xe   :  { %379 = dma.done.wait [#allocation7], 16  }
   0xf   :  { %380 = vsyncadd [#allocation7], 4294967280 }
  0x10   :  { %73 = sfence }
  0x11   :  { %v314_v0 = vld [vmem:[%s493_s4] ss:$0 sm:$0xff]  ;;  %v159_v1 = vld [vmem:[#allocation8] sm:$0xff]  ;;  %vm90_vm0 = vcmask 261120   ;;  %v160_v5 = vld [vmem:[#allocation8 + $0x8] sm:$0xff]  ;;  %v112_v18 = vlaneseq  ;;  %v103_v19 = vstv %s494_s5  ;;  %vm118_vm1 = vcmask 1041409  }
  0x12   :  { %v161_v2 = vld [vmem:[#allocation8 + $0x10] sm:$0xff]  ;;  %v163_v3 = vmul.f32 %v314_v0, %v159_v1  ;;  %v162_v6 = vld [vmem:[#allocation8 + $0x18] sm:$0xff]  ;;  %v164_v9 = vmul.f32 %v314_v0, %v160_v5  ;;  %v80_v13 = vld [vmem:[#allocation5 + $0x8] sm:$0xff]  ;;  %vm120_vm2 = vcmask 1042434   ;;  %vm122_vm3 = vcmask 1043459   ;;  %s75_s5 = sld [smem:[#allocation10]] }
  0x13   :  { %v165_v4 = vmul.f32 %v314_v0, %v161_v2  ;;  %v166_v10 = vmul.f32 %v314_v0, %v162_v6  ;;  %v87_v14 = vmul.f32 %v314_v0, %v80_v13  ;;  %v451_v20 = vand.u32 127, %v112_v18  ;;  %v81_v34 = vld [vmem:[#allocation5 + $0x10] sm:$0xff]  ;;  %v82_v36 = vld [vmem:[#allocation5 + $0x18] sm:$0xff]  ;;  %v79_v40 = vld [vmem:[#allocation5] sm:$0xff]  ;;  %s307_s23 = sld [smem:[#allocation10 + $0x1]] }
  0x14   :  { %v167_v7 = vsel %vm90_vm0, %v163_v3, 0.0  ;;  %v170_v11 = vsel %vm90_vm0, %v164_v9, 0.0  ;;  %v88_v35 = vmul.f32 %v314_v0, %v81_v34  ;;  %v89_v37 = vmul.f32 %v314_v0, %v82_v36  ;;  %v227_v43 = vld [vmem:[%s492_s3] sm:$0xff] }
  0x15   :  { %v173_v8 = vsel %vm90_vm0, %v165_v4, 0.0  ;;  %168 = vadd.xlane.f32.xlu0 %v167_v7  ;;  %v176_v12 = vsel %vm90_vm0, %v166_v10, 0.0  ;;  %v94_v15 = vsel %vm90_vm0, %v87_v14, 0.0  ;;  %v86_v41 = vmul.f32 %v314_v0, %v79_v40  ;;  %v234_v52 = vld [vmem:[%s491_s2] sm:$0xff] }
  0x16   :  { %174 = vadd.xlane.f32.xlu1 %v173_v8  ;;  %v97_v38 = vsel %vm90_vm0, %v88_v35, 0.0  ;;  %v100_v39 = vsel %vm90_vm0, %v89_v37, 0.0  ;;  %v228_v44 = vsub.f32 1.0, %v227_v43  ;;  %vm157_vm4 = vcmask 31744  }
  0x17   :  { %v91_v42 = vsel %vm90_vm0, %v86_v41, 0.0  ;;  %vm279_vm5 = vcmask 1040384   ;;  %vm281_vm6 = vcmask 1041408   ;;  %vm283_vm7 = vcmask 1042432  }
  0x18   :  { %v229_v45 = vstv %s75_s5  ;;  %vm285_vm8 = vcmask 1043456   ;;  %vm287_vm9 = vcmask 1044480   ;;  %vm289_vm10 = vcmask 1045504  }
  0x19   :  { %v231_v46 = vstv %s307_s23  ;;  %v230_v47 = vmul.f32 %v229_v45, %v228_v44  ;;  %s77_s24 = ssub.f32 1.0, %s307_s23  ;;  %vm291_vm11 = vcmask 1046528  }
  0x1b   :  { %v232_v48 = vmul.f32 %v231_v46, %v230_v47  ;;  %v235_v49 = vstv %s77_s24 }
  0x1d   :  { %171 = vadd.xlane.f32.xlu0 %v170_v11  ;;  %233 = vst.msk [vmem:[#allocation3] sm:$0xff] %vm157_vm4, %v232_v48 }
  0x1e   :  { %177 = vadd.xlane.f32.xlu1 %v176_v12 }
  0x24   :  { %v241_v6 = vld [vmem:[#allocation3] sm:$0xff] }
  0x25   :  { %95 = vadd.xlane.f32.xlu0 %v94_v15 }
  0x26   :  { %98 = vadd.xlane.f32.xlu1 %v97_v38 }
  0x2d   :  { %101 = vadd.xlane.f32.xlu0 %v100_v39 }
  0x88   :  { %v169_v16 = vpop.xlane.xlu0 %168 }
  0x89   :  { %v175_v17 = vpop.xlane.xlu1 %174  ;;  %v179_v21 = vadd.f32 %v169_v16, %v103_v19 }
  0x8a   :  { %v181_v22 = vadd.f32 %v175_v17, %v103_v19 }
  0x8b   :  { %v187_v27 = vperm.slane %v179_v21, %v451_v20 }
  0x8c   :  { %v189_v30 = vperm.slane %v181_v22, %v451_v20 }
  0x90   :  { %v172_v23 = vpop.xlane.xlu0 %171 }
  0x91   :  { %v178_v24 = vpop.xlane.xlu1 %177  ;;  %v180_v25 = vadd.f32 %v172_v23, %v103_v19 }
  0x92   :  { %v182_v26 = vadd.f32 %v178_v24, %v103_v19 }
  0x93   :  { %v188_v28 = vperm.slane %v180_v25, %v451_v20 }
  0x94   :  { %v190_v29 = vperm.slane %v182_v26, %v451_v20 }
  0x95   :  { %v191_v31 = vsel %vm118_vm1, %v188_v28, %v187_v27 }
  0x96   :  { %v192_v32 = vsel %vm120_vm2, %v189_v30, %v191_v31 }
  0x97   :  { %v193_v33 = vsel %vm122_vm3, %v190_v29, %v192_v32 }
  0x98   :  { %195 = vxpose.xlu2.b32.start.end [1/1] (short) (narrow) %v193_v33, 8  ;;  %v96_v55 = vpop.xlane.xlu0 %95 }
  0x99   :  { %v99_v56 = vpop.xlane.xlu1 %98  ;;  %v105_v59 = vadd.f32 %v103_v19, %v96_v55 }
  0x9a   :  { %v106_v58 = vadd.f32 %v103_v19, %v99_v56 }
  0x9b   :  { %v115_v0 = vperm.slane %v105_v59, %v451_v20 }
  0x9c   :  { %v116_v63 = vperm.slane %v106_v58, %v451_v20 }
  0xa0   :  { %v102_v57 = vpop.xlane.xlu0 %101 }
  0xa1   :  { %v107_v60 = vadd.f32 %v103_v19, %v102_v57 }
  0xa3   :  { %v117_v2 = vperm.slane %v107_v60, %v451_v20 }
 0x109   :  { %92 = vadd.xlane.f32.xlu2 %v91_v42 }
 0x131   :  { %v211_v50 = vpop.trf.xlu2 }
 0x132   :  { %v236_v51 = vmul.f32 %v235_v49, %v211_v50  ;;  %v242_v7 = vmul.f32 %v241_v6, %v211_v50 }
 0x134   :  { %v237_v53 = vmul.f32 %v236_v51, %v230_v47 }
 0x136   :  { %v238_v54 = vadd.f32 %v237_v53, %v234_v52 }
 0x138   :  { %239 = vst.msk [vmem:[#allocation2] sm:$0xff] %vm157_vm4, %v238_v54 }
 0x13f   :  { %v240_v8 = vld [vmem:[#allocation2] sm:$0xff] }
 0x140   :  { %v243_v9 = vadd.f32 %v242_v7, %v240_v8 }
 0x142   :  { %v245_v10 = vrot.slane %v243_v9, 1 }
 0x144   :  { %v247_v11 = vmul.f32 %v245_v10, %v241_v6 }
 0x146   :  { %v248_v12 = vadd.f32 %v247_v11, %v240_v8 }
 0x148   :  { %v250_v13 = vrot.slane %v248_v12, 1 }
 0x14a   :  { %v252_v14 = vmul.f32 %v250_v13, %v241_v6 }
 0x14c   :  { %v253_v15 = vadd.f32 %v252_v14, %v240_v8 }
 0x14e   :  { %v255_v16 = vrot.slane %v253_v15, 1 }
 0x150   :  { %v257_v17 = vmul.f32 %v255_v16, %v241_v6 }
 0x152   :  { %v258_v18 = vadd.f32 %v257_v17, %v240_v8 }
 0x17c   :  { %v93_v61 = vpop.xlane.xlu2 %92 }
 0x17d   :  { %v104_v62 = vadd.f32 %v103_v19, %v93_v61  ;;  %v260_v19 = vrot.slane %v258_v18, 1 }
 0x17f   :  { %v114_v1 = vperm.slane %v104_v62, %v451_v20  ;;  %v262_v20 = vmul.f32 %v260_v19, %v241_v6 }
 0x181   :  { %v119_v3 = vsel %vm118_vm1, %v115_v0, %v114_v1  ;;  %v263_v21 = vadd.f32 %v262_v20, %v240_v8 }
 0x182   :  { %v121_v4 = vsel %vm120_vm2, %v116_v63, %v119_v3 }
 0x183   :  { %v123_v5 = vsel %vm122_vm3, %v117_v2, %v121_v4  ;;  %v265_v22 = vrot.slane %v263_v21, 1 }
 0x184   :  { %125 = vxpose.xlu1.b32.start.end [1/1] (short) (narrow) %v123_v5, 8 }
 0x185   :  { %v267_v23 = vmul.f32 %v265_v22, %v241_v6 }
 0x187   :  { %v268_v24 = vadd.f32 %v267_v23, %v240_v8 }
 0x189   :  { %v270_v25 = vrot.slane %v268_v24, 1 }
 0x18b   :  { %v272_v26 = vmul.f32 %v270_v25, %v241_v6 }
 0x18d   :  { %v273_v27 = vadd.f32 %v272_v26, %v240_v8 }
 0x18f   :  { %v275_v28 = vrot.slane %v273_v27, 1 }
 0x191   :  { %v277_v29 = vmul.f32 %v275_v28, %v241_v6 }
 0x193   :  { %v278_v30 = vadd.f32 %v277_v29, %v240_v8 }
 0x195   :  { %v280_v31 = vsel %vm279_vm5, %v278_v30, %v273_v27 }
 0x196   :  { %v282_v32 = vsel %vm281_vm6, %v280_v31, %v268_v24 }
 0x197   :  { %v284_v33 = vsel %vm283_vm7, %v282_v32, %v263_v21 }
 0x198   :  { %v286_v34 = vsel %vm285_vm8, %v284_v33, %v258_v18 }
 0x199   :  { %v288_v36 = vsel %vm287_vm9, %v286_v34, %v253_v15 }
 0x19a   :  { %v290_v37 = vsel %vm289_vm10, %v288_v36, %v248_v12 }
 0x19b   :  { %v292_v38 = vsel %vm291_vm11, %v290_v37, %v243_v9 }
 0x228   :  { %v141_v35 = vpop.trf.xlu1 }
 0x229   :  { %158 = vst.msk [vmem:[%s497_s8] sm:$0xff] %vm157_vm4, %v141_v35 }
 0x230   :  { %v293_v39 = vld [vmem:[%s497_s8] sm:$0xff] }
 0x231   :  { %v294_v40 = vsub.f32 %v292_v38, %v293_v39 }
 0x233   :  { %295 = vst.msk [vmem:[%s496_s7] sm:$0xff] %vm157_vm4, %v294_v40 }
 0x234   :  { %304 = vsyncpa [#allocation6], 1 }
 0x235   :  { %305 = vsyncpa [#allocation9], 1 }
 0x236   :  { %306 = vsyncpa [#allocation7], 1 }

</bundles_post_ra>
